<compile_context>
chip_gen: v7x
topology: tpu7x:2x2x1
jax: 0.10.0
libtpu: 0.0.40
codegen_flags: <defaults>
</compile_context>

<pallas_src>
import jax
import jax.numpy as jnp
from jax.experimental import pallas as pl
from jax.experimental.pallas import tpu as pltpu


def _critic_kernel(x_ref, w1_ref, b1_ref, w2_ref, b2_ref,
                   w2h_ref, b2h_ref, w3_ref, b3_ref, o_ref):
    # x_ref   : (tm, d_in)   input dtype (f32 or bf16)
    # w1_ref  : (units, d_in);  w2/w2h: (units, units)   [PyTorch (out, in)]
    # b*_ref  : (units, 1)  f32
    # w3_ref  : (units, 1)  f32
    # b3_ref  : (1,)        f32 in SMEM
    # o_ref   : (1, tm)     f32
    cdt = w1_ref.dtype                               # compute dtype (f32 / bf16)

    # Put the batch on the lane axis: tiny (tm, d_in) -> (d_in, tm) transpose,
    # hidden under the x DMA.
    xt = x_ref[...].T.astype(cdt)                    # (d_in, tm)

    h = jnp.dot(w1_ref[...], xt, preferred_element_type=jnp.float32) + b1_ref[...]
    h = jnp.maximum(h, 0.0).astype(cdt)              # ReLU(fc1), (units, tm)

    h = jnp.dot(w2_ref[...], h, preferred_element_type=jnp.float32) + b2_ref[...]
    h = jnp.maximum(h, 0.0).astype(cdt)              # ReLU(fc2)

    h = jnp.dot(w2h_ref[...], h, preferred_element_type=jnp.float32) + b2h_ref[...]
    h = jnp.maximum(h, 0.0)                          # ReLU(fc2h), f32 epilogue

    # fc3 (K=units, N=1): VPU multiply + sublane reduce; output stays lane-dense.
    out = jnp.sum(h * w3_ref[...], axis=0, keepdims=True)     # (1, tm)
    o_ref[...] = (out + b3_ref[0]).astype(o_ref.dtype)


def _choose_tile(B, d_in, units, tm_max):
    """Pick the batch (lane-axis) tile size."""
    if B <= 128:
        return B                        # one block exactly covering the batch
    tm_max = max(128, (min(int(tm_max), 4096) // 128) * 128)
    # Keep live columns (x + 3 intermediates + out, f32) under ~8 MiB.
    bytes_per_col = 4 * (d_in + 3 * units + 1)
    vmem_cap = max(128, ((8 << 20) // bytes_per_col // 128) * 128)
    # Aim for >= 4 grid steps so both v7x TensorCores get work and the
    # per-step x DMA is hidden by double-buffering.
    tm = pl.cdiv(pl.cdiv(B, 4), 128) * 128
    return max(128, min(tm, tm_max, vmem_cap))


def critic_forward(x_a, params, *, tm_max=2048, compute_dtype=jnp.bfloat16):
    """Fused Critic forward pass.

    x_a:    (B, 2*(state_size+action_size))
    params: dict with w1,b1,w2,b2,w2h,b2h,w3,b3 in PyTorch (out, in) layout.
    Returns (B,) float32  (matches PyTorch `out.view(-1)`).

    Note: with the default bf16 compute dtype, activations/weights are bf16
    (biases, accumulation and the fc3 epilogue stay f32), so expect
    layer-compounded bf16 rounding vs. an f32 reference.
    """
    B, d_in = x_a.shape
    units, d_in_w = params["w1"].shape
    assert d_in_w == d_in

    tm = _choose_tile(B, d_in, units, tm_max)
    grid = (pl.cdiv(B, tm),)

    cdt = compute_dtype
    # Weights in PyTorch (out, in) layout; cast once (tiny, batch-invariant).
    w1 = params["w1"].astype(cdt)                          # (units, d_in)
    w2 = params["w2"].astype(cdt)                          # (units, units)
    w2h = params["w2h"].astype(cdt)                        # (units, units)
    # fc3 weight and all biases stay f32 (VPU / bias path).
    w3c = params["w3"].reshape(units, 1).astype(jnp.float32)
    b1c = params["b1"].reshape(units, 1).astype(jnp.float32)
    b2c = params["b2"].reshape(units, 1).astype(jnp.float32)
    b2hc = params["b2h"].reshape(units, 1).astype(jnp.float32)
    b3s = params["b3"].reshape(1).astype(jnp.float32)      # (1,) SMEM scalar

    # Weights/biases are grid-resident (constant index_map).  For large
    # `units` drop their double-buffering (pure VMEM waste) -- matters on
    # v7x (64 MiB physical VMEM).  Harmless default at small units.
    w_kwargs = dict(pipeline_mode=pl.Buffered(1)) if units >= 256 else {}

    def _resident(shape):
        return pl.BlockSpec(shape, lambda i: (0, 0), **w_kwargs)

    # Rough VMEM estimate; raise the scoped limit only when the default would
    # be tight (large `units`).  No-op for small configs.
    wbytes = (w1.size * w1.dtype.itemsize + w2.size * w2.dtype.itemsize
              + w2h.size * w2h.dtype.itemsize) * (1 if w_kwargs else 2)
    est = (wbytes
           + 2 * tm * d_in * x_a.dtype.itemsize            # double-buffered x
           + 2 * tm * 4                                     # double-buffered out
           + 4 * units * tm * 4)                            # live intermediates
    vmem_limit = int(min(est * 3 // 2, 64 << 20)) if est > (24 << 20) else None

    out = pl.pallas_call(
        _critic_kernel,
        out_shape=jax.ShapeDtypeStruct((1, B), jnp.float32),
        grid_spec=pltpu.PrefetchScalarGridSpec(
            num_scalar_prefetch=0,
            grid=grid,
            in_specs=[
                # x tile straight from HBM in its natural (B, d_in) layout.
                # TODO(synk): if a trace shows exposed x DMA at tm=128, add
                # pipeline_mode=pl.Buffered(3) here.
                pl.BlockSpec((tm, d_in), lambda i: (i, 0)),
                _resident(w1.shape), _resident(b1c.shape),
                _resident(w2.shape), _resident(b2c.shape),
                _resident(w2h.shape), _resident(b2hc.shape),
                _resident(w3c.shape),
                pl.BlockSpec(memory_space=pltpu.MemorySpace.SMEM),  # b3 scalar
            ],
            out_specs=pl.BlockSpec((1, tm), lambda i: (0, i)),  # lane-dense out
        ),
        compiler_params=pltpu.CompilerParams(
            dimension_semantics=("parallel",),
            vmem_limit_bytes=vmem_limit),
    )(x_a, w1, b1c, w2, b2c, w2h, b2hc, w3c, b3s)

    return out[0, :B]                  # matches PyTorch out.view(-1)


def init_critic_params(key, state_size, action_size, units):
    """Deterministic init mimicking nn.Linear default, PyTorch (out, in) layout."""
    d_in = 2 * (state_size + action_size)
    dims = [(units, d_in), (units, units), (units, units), (1, units)]
    names = ["1", "2", "2h", "3"]
    params = {}
    for (fan_out, fan_in), n in zip(dims, names):
        key, kw, kb = jax.random.split(key, 3)
        bound = 1.0 / (fan_in ** 0.5)
        params[f"w{n}"] = jax.random.uniform(
            kw, (fan_out, fan_in), jnp.float32, -bound, bound)
        params[f"b{n}"] = jax.random.uniform(
            kb, (fan_out,), jnp.float32, -bound, bound)
    return params


def _reference_forward(x_a, p):
    hp = jax.lax.Precision.HIGHEST
    h = jnp.maximum(jnp.dot(x_a, p["w1"].T, precision=hp) + p["b1"], 0.0)
    h = jnp.maximum(jnp.dot(h, p["w2"].T, precision=hp) + p["b2"], 0.0)
    h = jnp.maximum(jnp.dot(h, p["w2h"].T, precision=hp) + p["b2h"], 0.0)
    return (jnp.dot(h, p["w3"].T, precision=hp) + p["b3"]).reshape(-1)


if __name__ == "__main__":
    state_size, action_size, units = 6, 2, 32
    d_in = 2 * (state_size + action_size)      # = 16

    key = jax.random.PRNGKey(0)
    key, kx = jax.random.split(key)
    params = init_critic_params(key, state_size, action_size, units)

    # Small batch: single block exactly covering the batch (no padding anywhere).
    x_small = jax.random.normal(kx, (8, d_in), jnp.float32)
    ref_small = _reference_forward(x_small, params)
    out_f32 = jax.block_until_ready(
        critic_forward(x_small, params, compute_dtype=jnp.float32))
    assert out_f32.shape == (8,)
    assert jnp.allclose(out_f32, ref_small, atol=5e-4, rtol=5e-4)

    # Default bf16 compute (x cast in-kernel, weights cast once): layerwise
    # bf16 rounding vs. the f32 reference -> loose tolerance.
    out_bf16 = jax.block_until_ready(critic_forward(x_small, params))
    assert out_bf16.shape == (8,)
    assert jnp.allclose(out_bf16, ref_small, atol=2e-1, rtol=1e-1)

    # Non-divisible batch -> multi-step grid with a masked edge block.
    x_odd = jax.random.normal(jax.random.PRNGKey(1), (300, d_in), jnp.float32)
    out_odd = jax.block_until_ready(
        critic_forward(x_odd, params, compute_dtype=jnp.float32))
    ref_odd = _reference_forward(x_odd, params)
    assert out_odd.shape == (300,)
    assert jnp.allclose(out_odd, ref_odd, atol=5e-4, rtol=5e-4)

    # Larger aligned batch -> 4 parallel grid steps (megacore-shardable).
    x_big = jax.random.normal(jax.random.PRNGKey(2), (1024, d_in), jnp.float32)
    out_big = jax.block_until_ready(
        critic_forward(x_big, params, compute_dtype=jnp.float32))
    ref_big = _reference_forward(x_big, params)
    assert out_big.shape == (1024,)
    assert jnp.allclose(out_big, ref_big, atol=5e-4, rtol=5e-4)

    print("KERNEL_OK")
</pallas_src>

<mosaic_0001>
module attributes {stable_mosaic.version = 11 : i64} {
  func.func @_critic_kernel(%arg0: i32, %arg1: memref<8x16xf32, #tpu.memory_space<vmem>>, %arg2: memref<32x16xf32, #tpu.memory_space<vmem>>, %arg3: memref<32x1xf32, #tpu.memory_space<vmem>>, %arg4: memref<32x32xf32, #tpu.memory_space<vmem>>, %arg5: memref<32x1xf32, #tpu.memory_space<vmem>>, %arg6: memref<32x32xf32, #tpu.memory_space<vmem>>, %arg7: memref<32x1xf32, #tpu.memory_space<vmem>>, %arg8: memref<32x1xf32, #tpu.memory_space<vmem>>, %arg9: memref<1xf32, #tpu.memory_space<smem>>, %arg10: memref<1x8xf32, #tpu.memory_space<vmem>>) attributes {dimension_semantics = [#tpu.dimension_semantics<parallel>], iteration_bounds = array<i64: 1>, scalar_prefetch = 0 : i64, scratch_operands = 0 : i64, tpu.core_type = #tpu.core_type<tc>, window_params = [{transform_indices = @transform_0, window_bounds = array<i64: 8, 16>}, {pipeline_mode = #tpu.pipeline_mode<synchronous>, transform_indices = @transform_1, window_bounds = array<i64: 32, 16>}, {pipeline_mode = #tpu.pipeline_mode<synchronous>, transform_indices = @transform_2, window_bounds = array<i64: 32, 1>}, {pipeline_mode = #tpu.pipeline_mode<synchronous>, transform_indices = @transform_3, window_bounds = array<i64: 32, 32>}, {pipeline_mode = #tpu.pipeline_mode<synchronous>, transform_indices = @transform_4, window_bounds = array<i64: 32, 1>}, {pipeline_mode = #tpu.pipeline_mode<synchronous>, transform_indices = @transform_5, window_bounds = array<i64: 32, 32>}, {pipeline_mode = #tpu.pipeline_mode<synchronous>, transform_indices = @transform_6, window_bounds = array<i64: 32, 1>}, {pipeline_mode = #tpu.pipeline_mode<synchronous>, transform_indices = @transform_7, window_bounds = array<i64: 32, 1>}, {transform_indices = @transform_8, window_bounds = array<i64: 1>}, {transform_indices = @transform_9, window_bounds = array<i64: 1, 8>}]} {
    %c0 = arith.constant 0 : index
    %c0_0 = arith.constant 0 : index
    %0 = vector.load %arg1[%c0, %c0_0] : memref<8x16xf32, #tpu.memory_space<vmem>>, vector<8x16xf32>
    %1 = tpu.transpose %0, [1, 0] : vector<8x16xf32> -> vector<16x8xf32>
    %c0_1 = arith.constant 0 : index
    %c0_2 = arith.constant 0 : index
    %2 = vector.load %arg2[%c0_1, %c0_2] : memref<32x16xf32, #tpu.memory_space<vmem>>, vector<32x16xf32>
    %cst = arith.constant dense<0.000000e+00> : vector<32x8xf32>
    %3 = tpu.matmul %2, %1, %cst {dimension_numbers = #tpu.dot_dimension_numbers<[1], [0], [0], [1], [0, 0, 1, 1], [], []>} : vector<32x16xf32>, vector<16x8xf32>, vector<32x8xf32> -> vector<32x8xf32>
    %c0_3 = arith.constant 0 : index
    %c0_4 = arith.constant 0 : index
    %4 = vector.load %arg3[%c0_3, %c0_4] : memref<32x1xf32, #tpu.memory_space<vmem>>, vector<32x1xf32>
    %5 = vector.broadcast %4 : vector<32x1xf32> to vector<32x8xf32>
    %6 = arith.addf %3, %5 : vector<32x8xf32>
    %cst_5 = arith.constant 0.000000e+00 : f32
    %7 = vector.broadcast %cst_5 : f32 to vector<32x8xf32>
    %8 = arith.maximumf %6, %7 : vector<32x8xf32>
    %c0_6 = arith.constant 0 : index
    %c0_7 = arith.constant 0 : index
    %9 = vector.load %arg4[%c0_6, %c0_7] : memref<32x32xf32, #tpu.memory_space<vmem>>, vector<32x32xf32>
    %cst_8 = arith.constant dense<0.000000e+00> : vector<32x8xf32>
    %10 = tpu.matmul %9, %8, %cst_8 {dimension_numbers = #tpu.dot_dimension_numbers<[1], [0], [0], [1], [0, 0, 1, 1], [], []>} : vector<32x32xf32>, vector<32x8xf32>, vector<32x8xf32> -> vector<32x8xf32>
    %c0_9 = arith.constant 0 : index
    %c0_10 = arith.constant 0 : index
    %11 = vector.load %arg5[%c0_9, %c0_10] : memref<32x1xf32, #tpu.memory_space<vmem>>, vector<32x1xf32>
    %12 = vector.broadcast %11 : vector<32x1xf32> to vector<32x8xf32>
    %13 = arith.addf %10, %12 : vector<32x8xf32>
    %cst_11 = arith.constant 0.000000e+00 : f32
    %14 = vector.broadcast %cst_11 : f32 to vector<32x8xf32>
    %15 = arith.maximumf %13, %14 : vector<32x8xf32>
    %c0_12 = arith.constant 0 : index
    %c0_13 = arith.constant 0 : index
    %16 = vector.load %arg6[%c0_12, %c0_13] : memref<32x32xf32, #tpu.memory_space<vmem>>, vector<32x32xf32>
    %cst_14 = arith.constant dense<0.000000e+00> : vector<32x8xf32>
    %17 = tpu.matmul %16, %15, %cst_14 {dimension_numbers = #tpu.dot_dimension_numbers<[1], [0], [0], [1], [0, 0, 1, 1], [], []>} : vector<32x32xf32>, vector<32x8xf32>, vector<32x8xf32> -> vector<32x8xf32>
    %c0_15 = arith.constant 0 : index
    %c0_16 = arith.constant 0 : index
    %18 = vector.load %arg7[%c0_15, %c0_16] : memref<32x1xf32, #tpu.memory_space<vmem>>, vector<32x1xf32>
    %19 = vector.broadcast %18 : vector<32x1xf32> to vector<32x8xf32>
    %20 = arith.addf %17, %19 : vector<32x8xf32>
    %cst_17 = arith.constant 0.000000e+00 : f32
    %21 = vector.broadcast %cst_17 : f32 to vector<32x8xf32>
    %22 = arith.maximumf %20, %21 : vector<32x8xf32>
    %c0_18 = arith.constant 0 : index
    %c0_19 = arith.constant 0 : index
    %23 = vector.load %arg8[%c0_18, %c0_19] : memref<32x1xf32, #tpu.memory_space<vmem>>, vector<32x1xf32>
    %24 = vector.broadcast %23 : vector<32x1xf32> to vector<32x8xf32>
    %25 = arith.mulf %22, %24 : vector<32x8xf32>
    %cst_20 = arith.constant dense<0.000000e+00> : vector<8xf32>
    %26 = vector.multi_reduction <add>, %25, %cst_20 [0] : vector<32x8xf32> to vector<8xf32>
    %27 = vector.shape_cast %26 : vector<8xf32> to vector<1x8xf32>
    %c0_21 = arith.constant 0 : index
    %28 = memref.load %arg9[%c0_21] : memref<1xf32, #tpu.memory_space<smem>>
    %29 = vector.broadcast %28 : f32 to vector<1x8xf32>
    %30 = arith.addf %27, %29 : vector<1x8xf32>
    %c0_22 = arith.constant 0 : index
    %c0_23 = arith.constant 0 : index
    %31 = vector.load %arg10[%c0_22, %c0_23] : memref<1x8xf32, #tpu.memory_space<vmem>>, vector<1x8xf32>
    tpu.vector_store %arg10[%c0_22, %c0_23], %30 {strides = array<i32>} : memref<1x8xf32, #tpu.memory_space<vmem>>, vector<1x8xf32>,
    return
  }
  func.func @transform_0(%arg0: i32) -> (i32, i32) {
    %c0_i32 = arith.constant 0 : i32
    %c0_i32_0 = arith.constant 0 : i32
    return %arg0, %c0_i32 : i32, i32
  }
  func.func @transform_1(%arg0: i32) -> (i32, i32) {
    %c0_i32 = arith.constant 0 : i32
    %c0_i32_0 = arith.constant 0 : i32
    %c0_i32_1 = arith.constant 0 : i32
    return %c0_i32, %c0_i32_0 : i32, i32
  }
  func.func @transform_2(%arg0: i32) -> (i32, i32) {
    %c0_i32 = arith.constant 0 : i32
    %c0_i32_0 = arith.constant 0 : i32
    %c0_i32_1 = arith.constant 0 : i32
    return %c0_i32, %c0_i32_0 : i32, i32
  }
  func.func @transform_3(%arg0: i32) -> (i32, i32) {
    %c0_i32 = arith.constant 0 : i32
    %c0_i32_0 = arith.constant 0 : i32
    %c0_i32_1 = arith.constant 0 : i32
    return %c0_i32, %c0_i32_0 : i32, i32
  }
  func.func @transform_4(%arg0: i32) -> (i32, i32) {
    %c0_i32 = arith.constant 0 : i32
    %c0_i32_0 = arith.constant 0 : i32
    %c0_i32_1 = arith.constant 0 : i32
    return %c0_i32, %c0_i32_0 : i32, i32
  }
  func.func @transform_5(%arg0: i32) -> (i32, i32) {
    %c0_i32 = arith.constant 0 : i32
    %c0_i32_0 = arith.constant 0 : i32
    %c0_i32_1 = arith.constant 0 : i32
    return %c0_i32, %c0_i32_0 : i32, i32
  }
  func.func @transform_6(%arg0: i32) -> (i32, i32) {
    %c0_i32 = arith.constant 0 : i32
    %c0_i32_0 = arith.constant 0 : i32
    %c0_i32_1 = arith.constant 0 : i32
    return %c0_i32, %c0_i32_0 : i32, i32
  }
  func.func @transform_7(%arg0: i32) -> (i32, i32) {
    %c0_i32 = arith.constant 0 : i32
    %c0_i32_0 = arith.constant 0 : i32
    %c0_i32_1 = arith.constant 0 : i32
    return %c0_i32, %c0_i32_0 : i32, i32
  }
  func.func @transform_8(%arg0: i32) -> i32 {
    %c0_i32 = arith.constant 0 : i32
    %c0_i32_0 = arith.constant 0 : i32
    return %c0_i32 : i32
  }
  func.func @transform_9(%arg0: i32) -> (i32, i32) {
    %c0_i32 = arith.constant 0 : i32
    %c0_i32_0 = arith.constant 0 : i32
    return %c0_i32, %arg0 : i32, i32
  }
}

</mosaic_0001>

<bundles_post_ra>
// kernel: tpu_custom_call.1
= control target key start
LH: loop header
LB: loop body
LE: loop exit
PB: predicated region body
PF: predicated region fallthrough
CT: control target
= control target key end

     0   :  { %vm63_vm0 = vcmask 130048   ;;  %v602_v4 = vmov 0   ;;  %s774_s0 = inlined_call_operand.vmem [shape: f32[8,16], index: 0, kind: input, shape index: {}]   ;;  %s775_s1 = inlined_call_operand.vmem [shape: f32[32,16], index: 1, kind: input, shape index: {}]   ;;  %s776_s2 = inlined_call_operand.vmem [shape: f32[32,1], index: 2, kind: input, shape index: {}]   ;;  %s777_s3 = inlined_call_operand.vmem [shape: f32[32,32], index: 3, kind: input, shape index: {}]   ;;  %s778_s4 = inlined_call_operand.vmem [shape: f32[32,1], index: 4, kind: input, shape index: {}]   ;;  %s779_s5 = inlined_call_operand.vmem [shape: f32[32,32], index: 5, kind: input, shape index: {}]   ;;  %s780_s6 = inlined_call_operand.vmem [shape: f32[32,1], index: 6, kind: input, shape index: {}]   ;;  %s781_s7 = inlined_call_operand.vmem [shape: f32[32,1], index: 7, kind: input, shape index: {}]   ;;  %s782_s8 = inlined_call_operand.<no memory space> [shape: f32[1], index: 8, kind: input, shape index: {}]   ;;  %s783_s9 = inlined_call_operand.hbm [shape: f32[1,8], index: 9, kind: output, shape index: {}]  }
   0x1   :  { %v34_v0 = vld [vmem:[%s774_s0] sm:$0xff]  ;;  %v36_v3 = vld [vmem:[%s775_s1 + $0x8] sm:$0xff]  ;;  %576 = vset.pattern.permute.xlu0 %v602_v4  ;;  %v41_v5 = vld [vmem:[%s776_s2 + $0x10] sm:$0xff]  ;;  %577 = vset.pattern.permute.xlu1 %v602_v4 }
   0x2   :  { %v35_v1 = vld [vmem:[%s775_s1] sm:$0xff]  ;;  %522 = vmatprep.subr.msk.mxu0 %vm63_vm0, %v34_v0  ;;  %v37_v6 = vld [vmem:[%s775_s1 + $0x10] sm:$0xff]  ;;  %55 = vperm.xlu1 %577, %v41_v5   ;;  %v40_v7 = vld [vmem:[%s776_s2 + $0x8] sm:$0xff] }
   0x3   :  { %524 = vmatprep.mubr.msk.f32.mxu0 %vm63_vm0, %v35_v1  ;;  %v39_v2 = vld [vmem:[%s776_s2] sm:$0xff]  ;;  %523 = vmatpush3.xpose.msk.msra.mxu0 %vm63_vm0, %v34_v0  ;;  %v42_v8 = vld [vmem:[%s776_s2 + $0x18] sm:$0xff] }
   0x4   :  { %45 = vperm.xlu0 %576, %v39_v2   ;;  %v38_v9 = vld [vmem:[%s775_s1 + $0x18] sm:$0xff] }
   0x6   :  { %525 = vmatmul.mubr.msk.f32.vlgmr.msra.gmra.mrb[0].mxu0 %vm63_vm0, %v36_v3 }
   0x7   :  { %527 = vmatprep.mubr.msk.f32.mxu0 %vm63_vm0, %v37_v6 }
   0x8   :  { %50 = vperm.xlu0 %576, %v40_v7  }
   0x9   :  { %15 = vsyncpa [#allocation4], 0  ;;  %60 = vperm.xlu1 %577, %v42_v8   ;;  %v172_v10 = vld [vmem:[%s778_s4] sm:$0xff]  ;;  %v173_v11 = vld [vmem:[%s778_s4 + $0x8] sm:$0xff]  ;;  %vm196_vm1 = vcmask 261120   ;;  %vm455_vm2 = vcmask 64512  }
   0xa   :  { %528 = vmatmul.mubr.msk.f32.gmra.mrb[2].mxu0 %vm63_vm0, %v38_v9  ;;  %v174_v12 = vld [vmem:[%s778_s4 + $0x10] sm:$0xff]  ;;  %v175_v13 = vld [vmem:[%s778_s4 + $0x18] sm:$0xff]  ;;  %v302_v14 = vld [vmem:[%s780_s6] sm:$0xff]  ;;  %s603_s16 = smov [#allocation3]   ;;  %vm472_vm3 = vcmask 57344  }
   0xb   :  { %v303_v15 = vld [vmem:[%s780_s6 + $0x8] sm:$0xff]  ;;  %v304_v16 = vld [vmem:[%s780_s6 + $0x10] sm:$0xff]  ;;  %v305_v17 = vld [vmem:[%s780_s6 + $0x18] sm:$0xff]  ;;  %s480_s0 = sshll.u32 %s603_s16, 4  ;;  %s481_s0 = int_to_ptr.vmem [resolvable:$true] %s480_s0 }
   0xc   :  { %178 = vperm.xlu0 %576, %v172_v10   ;;  %v427_v18 = vld [vmem:[%s781_s7] sm:$0xff]  ;;  %v428_v19 = vld [vmem:[%s781_s7 + $0x8] sm:$0xff]  ;;  %v429_v20 = vld [vmem:[%s781_s7 + $0x10] sm:$0xff]  ;;  %s578_s17 = scalar_lea.vmem %s481_s0, 16  ;;  %s582_s4 = scalar_lea.vmem %s481_s0, 32 }
   0xd   :  { %183 = vperm.xlu1 %577, %v173_v11   ;;  %v430_v21 = vld [vmem:[%s781_s7 + $0x18] sm:$0xff]  ;;  %v168_v22 = vld [vmem:[%s777_s3] sm:$0xff]  ;;  %v169_v41 = vld [vmem:[%s777_s3 + $0x8] sm:$0xff]  ;;  %p579_p0 = scmp.ne.s32.totalorder %s481_s0, %s578_s17  ;;  %p583_p1 = scmp.lt.s32.totalorder %s481_s0, %s481_s0 }
   0xe   :  { %538 = vmatprep.mubr.msk.f32.mxu1 %vm196_vm1, %v168_v22  ;;  %v170_v42 = vld [vmem:[%s777_s3 + $0x10] sm:$0xff]  ;;  %v171_v43 = vld [vmem:[%s777_s3 + $0x18] sm:$0xff]  ;;  %v298_v44 = vld [vmem:[%s779_s5] sm:$0xff]  ;;  %p584_p2 = scmp.lt.s32.totalorder %s582_s4, %s578_s17 }
   0xf   :  { %552 = vmatprep.mubr.msk.f32.mxu0 %vm196_vm1, %v298_v44  ;;  %v299_v63 = vld [vmem:[%s779_s5 + $0x8] sm:$0xff]  ;;  %v300_v0 = vld [vmem:[%s779_s5 + $0x10] sm:$0xff]  ;;  %v301_v1 = vld [vmem:[%s779_s5 + $0x18] sm:$0xff] }
  0x10   :  { %188 = vperm.xlu0 %576, %v174_v12   ;;  %p585_p3 = por %p584_p2, %p583_p1 }
  0x11   :  { %193 = vperm.xlu1 %577, %v175_v13  }
  0x12   :  { %p586_p4 = pnand %p585_p3, %p579_p0 }
  0x14   :  { %308 = vperm.xlu0 %576, %v302_v14  }
  0x15   :  { %313 = vperm.xlu1 %577, %v303_v15  }
  0x18   :  { %318 = vperm.xlu0 %576, %v304_v16  }
  0x19   :  { %323 = vperm.xlu1 %577, %v305_v17  }
  0x1c   :  { %433 = vperm.xlu0 %576, %v427_v18  }
  0x1d   :  { %438 = vperm.xlu1 %577, %v428_v19  }
  0x20   :  { %443 = vperm.xlu0 %576, %v429_v20  }
  0x21   :  { %448 = vperm.xlu1 %577, %v430_v21  }
  0x81   :  { %v56_v24 = vpop.permute.xlu1 %55 }
  0x83   :  { %v46_v23 = vpop.permute.xlu0 %45 }
  0x87   :  { %v51_v25 = vpop.permute.xlu0 %50 }
  0x88   :  { %v61_v31 = vpop.permute.xlu1 %60 }
  0x8b   :  { %v179_v46 = vpop.permute.xlu0 %178 }
  0x8c   :  { %v184_v45 = vpop.permute.xlu1 %183 }
  0x8f   :  { %v189_v55 = vpop.permute.xlu0 %188 }
  0x90   :  { %v194_v52 = vpop.permute.xlu1 %193 }
  0x93   :  { %v309_v2 = vpop.permute.xlu0 %308 }
  0x94   :  { %v314_v3 = vpop.permute.xlu1 %313 }
  0x97   :  { %v319_v4 = vpop.permute.xlu0 %318 }
  0x98   :  { %v324_v5 = vpop.permute.xlu1 %323 }
  0x9b   :  { %v434_v10 = vpop.permute.xlu0 %433 }
  0x9c   :  { %v439_v11 = vpop.permute.xlu1 %438 }
  0xd9   :  { %v526_v26 = vpop.f32.mrb[0].mxu0 }
  0xda   :  { %v151_v27 = vadd.f32 %v526_v26, %v51_v25  ;;  %v145_v28 = vpop.f32.mrb[1].mxu0  ;;  %v449_v25 = vpop.permute.xlu1 %448 }
  0xdb   :  { %v146_v29 = vadd.f32 %v145_v28, %v46_v23 }
  0xdc   :  { %v165_v30 = vmax.f32 %v151_v27, 0.0 }
  0xdd   :  { %v164_v32 = vmax.f32 %v146_v29, 0.0  ;;  %v529_v33 = vpop.f32.mrb[2].mxu0 }
  0xde   :  { %v161_v34 = vadd.f32 %v529_v33, %v61_v31  ;;  %v155_v35 = vpop.f32.mrb[3].mxu0 }
  0xdf   :  { %v156_v36 = vadd.f32 %v155_v35, %v56_v24  ;;  %v558_v37 = vpack.c.bf16 %v165_v30, %v164_v32  ;;  %v444_v24 = vpop.permute.xlu0 %443 }
  0xe0   :  { %v167_v38 = vmax.f32 %v161_v34, 0.0 }
  0xe1   :  { %v166_v39 = vmax.f32 %v156_v36, 0.0  ;;  %559 = vmatprep.subr.bf16.mxu1 %v558_v37 }
  0xe2   :  { %561 = vmatpush3.bf16.msra.mxu1 %v558_v37 }
  0xe3   :  { %v562_v40 = vpack.c.bf16 %v167_v38, %v166_v39  ;;  %v470_v38 = vstv %s782_s8 }
  0xe5   :  { %563 = vmatprep.subr.bf16.mxu1 %v562_v40 }
  0xe6   :  { %565 = vmatpush3.bf16.msra.mxu1 %v562_v40 }
  0xe9   :  { %539 = vmatmul.mubr.msk.f32.vlgmr.msra.gmra.mrb[0].mxu1 %vm196_vm1, %v169_v41 }
  0xea   :  { %541 = vmatprep.mubr.msk.f32.mxu1 %vm196_vm1, %v170_v42 }
  0xed   :  { %542 = vmatmul.mubr.msk.f32.gmra.mrb[2].mxu1 %vm196_vm1, %v171_v43 }
 0x1bc   :  { %v540_v47 = vpop.f32.mrb[0].mxu1 }
 0x1bd   :  { %v281_v48 = vadd.f32 %v540_v47, %v184_v45  ;;  %v275_v49 = vpop.f32.mrb[1].mxu1 }
 0x1be   :  { %v276_v50 = vadd.f32 %v275_v49, %v179_v46 }
 0x1bf   :  { %v295_v51 = vmax.f32 %v281_v48, 0.0 }
 0x1c0   :  { %v294_v53 = vmax.f32 %v276_v50, 0.0  ;;  %v543_v54 = vpop.f32.mrb[2].mxu1 }
 0x1c1   :  { %v291_v56 = vadd.f32 %v543_v54, %v194_v52  ;;  %v285_v57 = vpop.f32.mrb[3].mxu1 }
 0x1c2   :  { %v566_v58 = vpack.c.bf16 %v295_v51, %v294_v53  ;;  %v286_v59 = vadd.f32 %v285_v57, %v189_v55 }
 0x1c3   :  { %v297_v60 = vmax.f32 %v291_v56, 0.0 }
 0x1c4   :  { %v296_v61 = vmax.f32 %v286_v59, 0.0  ;;  %567 = vmatprep.subr.bf16.mxu0 %v566_v58 }
 0x1c5   :  { %569 = vmatpush3.bf16.msra.mxu0 %v566_v58 }
 0x1c6   :  { %v570_v62 = vpack.c.bf16 %v297_v60, %v296_v61 }
 0x1c8   :  { %571 = vmatprep.subr.bf16.mxu0 %v570_v62 }
 0x1c9   :  { %573 = vmatpush3.bf16.msra.mxu0 %v570_v62 }
 0x1cc   :  { %553 = vmatmul.mubr.msk.f32.vlgmr.msra.gmra.mrb[4].mxu0 %vm196_vm1, %v299_v63 }
 0x1cd   :  { %555 = vmatprep.mubr.msk.f32.mxu0 %vm196_vm1, %v300_v0 }
 0x1d0   :  { %556 = vmatmul.mubr.msk.f32.gmra.mrb[6].mxu0 %vm196_vm1, %v301_v1 }
 0x29f   :  { %v554_v6 = vpop.f32.mrb[4].mxu0 }
 0x2a0   :  { %v410_v7 = vadd.f32 %v554_v6, %v314_v3  ;;  %v404_v8 = vpop.f32.mrb[5].mxu0 }
 0x2a1   :  { %v405_v9 = vadd.f32 %v404_v8, %v309_v2 }
 0x2a2   :  { %v424_v12 = vmax.f32 %v410_v7, 0.0 }
 0x2a3   :  { %v423_v13 = vmax.f32 %v405_v9, 0.0  ;;  %v557_v14 = vpop.f32.mrb[6].mxu0 }
 0x2a4   :  { %v452_v15 = vmul.f32 %v439_v11, %v424_v12  ;;  %v420_v16 = vadd.f32 %v557_v14, %v324_v5  ;;  %v414_v17 = vpop.f32.mrb[7].mxu0 }
 0x2a5   :  { %v451_v18 = vmul.f32 %v434_v10, %v423_v13  ;;  %v415_v19 = vadd.f32 %v414_v17, %v319_v4 }
 0x2a6   :  { %v457_v20 = vsel %vm455_vm2, %v452_v15, 0.0  ;;  %v426_v21 = vmax.f32 %v420_v16, 0.0 }
 0x2a7   :  { %v456_v22 = vsel %vm455_vm2, %v451_v18, 0.0  ;;  %v425_v23 = vmax.f32 %v415_v19, 0.0 }
 0x2a8   :  { %v458_v26 = vadd.f32 %v457_v20, %v456_v22  ;;  %v454_v27 = vmul.f32 %v449_v25, %v426_v21 }
 0x2a9   :  { %v453_v28 = vmul.f32 %v444_v24, %v425_v23 }
 0x2aa   :  { %v461_v31 = vsel %vm455_vm2, %v454_v27, 0.0 }
 0x2ab   :  { %v459_v29 = vsel %vm455_vm2, %v453_v28, 0.0 }
 0x2ac   :  { %v460_v30 = vadd.f32 %v459_v29, %v458_v26 }
 0x2ae   :  { %v462_v32 = vadd.f32 %v461_v31, %v460_v30 }
 0x2b0   :  { %v463_v33 = vrot.slane %v462_v32, 4 }
 0x2b2   :  { %v464_v34 = vadd.f32 %v463_v33, %v462_v32 }
 0x2b4   :  { %v465_v35 = vrot.slane %v464_v34, 2 }
 0x2b6   :  { %v466_v36 = vadd.f32 %v465_v35, %v464_v34 }
 0x2b8   :  { %v467_v37 = vrot.slane %v466_v36, 1 }
 0x2ba   :  { %v468_v39 = vadd.f32 %v467_v37, %v466_v36 }
 0x2bc   :  { %v471_v40 = vadd.f32 %v470_v38, %v468_v39 }
 0x2be   :  { %473 = vst.msk [vmem:[#allocation3] sm:$0x1] %vm472_vm3, %v471_v40 }
 0x2bf   :  { %589 = shalt.err (!%p586_p4)
}
 0x2c0   :  { %s590_s20 = scalar_lea.hbm %s783_s9, 16 }
 0x2c1   :  { %p591_p5 = scmp.ne.s32.totalorder %s783_s9, %s590_s20  ;;  %p594_p6 = scmp.lt.u32.totalorder %s590_s20, %s783_s9 }
 0x2c3   :  { %p596_p7 = pnand %p594_p6, %p591_p5 }
 0x2c5   :  { %599 = shalt.err (!%p596_p7)
}
 0x2c6   :  { %483 = dma.vmem_to_hbm [thread:$0]  %s481_s0, 16, %s783_s9, [#allocation4]  }
 0x2c7   :  { %600 = dma.done.wait [#allocation4], 16  }
 0x2c8   :  { %601 = vsyncadd [#allocation4], 4294967280 }
 0x2c9   :  { %487 = vsyncpa [#allocation4], 1 }

</bundles_post_ra>
